<compile_context>
chip_gen: v7x
topology: tpu7x:2x2x1
jax: 0.10.0
libtpu: 0.0.40
codegen_flags: <defaults>
</compile_context>

<pallas_src>
import jax
import jax.numpy as jnp
from jax.experimental import pallas as pl
from jax.experimental.pallas import tpu as pltpu


def _rotary_kernel(inv_freq_ref, out_ref):
    # inv_freq_ref: (1, dim) float32 -- inv_freq duplicated along the lane axis.
    # out_ref:      (tile_seq, dim)  -- one seq tile of the output table.
    ts, dim = out_ref.shape

    # Global row index for this tile: t[r, j] = tile_start + r.
    row0 = pl.program_id(0) * ts
    local = jax.lax.broadcasted_iota(jnp.int32, (ts, dim), dimension=0)
    t = (row0 + local).astype(jnp.float32)

    # Single full-width, lane-dense store:
    #   out[r, j] = t[r] * inv_freq_full[j]   where inv_freq_full = [f, f]
    out_ref[...] = (t * inv_freq_ref[...]).astype(out_ref.dtype)


def rotary_embedding(seq_len: int, dim: int, dtype=jnp.float32, tile_seq: int = 1024):
    """Returns the (seq_len, dim) rotary frequency table (== torch forward)."""
    assert dim % 2 == 0, "dim must be even"

    # Deterministic "parameter" construction, matching torch __init__ exactly,
    # then duplicated so the kernel emits one full-width store.
    inv_freq = 1.0 / (10000.0 ** (jnp.arange(0, dim, 2, dtype=jnp.float32) / dim))
    inv_freq_full = jnp.concatenate([inv_freq, inv_freq]).reshape(1, dim)

    # Tile the sequence axis; for small tables use a single full-extent block
    # (block == full array dims satisfies the (8,128) rule for any shape).
    if seq_len <= tile_seq:
        ts = seq_len
    else:
        ts = tile_seq  # multiple of 8 (and 16, for bf16 sublane packing)
    grid = (pl.cdiv(seq_len, ts),)

    out = pl.pallas_call(
        _rotary_kernel,
        out_shape=jax.ShapeDtypeStruct((seq_len, dim), dtype),
        grid_spec=pltpu.PrefetchScalarGridSpec(
            num_scalar_prefetch=0,
            grid=grid,
            in_specs=[pl.BlockSpec((1, dim), lambda i: (0, 0))],
            out_specs=pl.BlockSpec((ts, dim), lambda i: (i, 0)),
        ),
        compiler_params=pltpu.CompilerParams(
            dimension_semantics=("parallel",),
        ),
    )(inv_freq_full)
    return out


def rotary_embedding_ref(seq_len: int, dim: int):
    """Pure-JAX reference mirroring the PyTorch forward."""
    inv_freq = 1.0 / (10000.0 ** (jnp.arange(0, dim, 2, dtype=jnp.float32) / dim))
    t = jnp.arange(seq_len, dtype=jnp.float32)
    freqs = jnp.einsum("i,j->ij", t, inv_freq)
    return jnp.concatenate((freqs, freqs), axis=-1)


if __name__ == "__main__":
    key = jax.random.PRNGKey(0)  # deterministic setup convention (no random params)
    del key

    # Small shapes consistent with the module: seq=8, hidden dim=32.
    seq_len, dim = 8, 32
    out = jax.block_until_ready(rotary_embedding(seq_len, dim))
    ref = rotary_embedding_ref(seq_len, dim)
    assert out.shape == (seq_len, dim)
    assert jnp.allclose(out, ref, atol=1e-6, rtol=1e-6), "mismatch vs reference (small)"

    # Exercise the tiled / pipelined path (multiple seq tiles).
    seq_len2, dim2 = 2048, 128
    out2 = jax.block_until_ready(rotary_embedding(seq_len2, dim2))
    ref2 = rotary_embedding_ref(seq_len2, dim2)
    assert out2.shape == (seq_len2, dim2)
    assert jnp.allclose(out2, ref2, atol=1e-5, rtol=1e-6), "mismatch vs reference (tiled)"

    print("KERNEL_OK")
</pallas_src>

<mosaic_0001>
module attributes {stable_mosaic.version = 11 : i64} {
  func.func @_rotary_kernel(%arg0: i32, %arg1: memref<1x32xf32, #tpu.memory_space<vmem>>, %arg2: memref<8x32xf32, #tpu.memory_space<vmem>>) attributes {dimension_semantics = [#tpu.dimension_semantics<parallel>], iteration_bounds = array<i64: 1>, scalar_prefetch = 0 : i64, scratch_operands = 0 : i64, tpu.core_type = #tpu.core_type<tc>, window_params = [{pipeline_mode = #tpu.pipeline_mode<synchronous>, transform_indices = @transform_0, window_bounds = array<i64: 1, 32>}, {transform_indices = @transform_1, window_bounds = array<i64: 8, 32>}]} {
    %c8_i32 = arith.constant 8 : i32
    %0 = arith.muli %arg0, %c8_i32 : i32
    %1 = tpu.iota {dimensions = array<i32: 0>} : vector<8x32xi32>
    %2 = vector.broadcast %0 : i32 to vector<8x32xi32>
    %3 = arith.addi %2, %1 : vector<8x32xi32>
    %4 = arith.sitofp %3 : vector<8x32xi32> to vector<8x32xf32>
    %c0 = arith.constant 0 : index
    %c0_0 = arith.constant 0 : index
    %5 = vector.load %arg1[%c0, %c0_0] : memref<1x32xf32, #tpu.memory_space<vmem>>, vector<1x32xf32>
    %6 = vector.broadcast %5 : vector<1x32xf32> to vector<8x32xf32>
    %7 = arith.mulf %4, %6 : vector<8x32xf32>
    %c0_1 = arith.constant 0 : index
    %c0_2 = arith.constant 0 : index
    %8 = vector.load %arg2[%c0_1, %c0_2] : memref<8x32xf32, #tpu.memory_space<vmem>>, vector<8x32xf32>
    tpu.vector_store %arg2[%c0_1, %c0_2], %7 {strides = array<i32>} : memref<8x32xf32, #tpu.memory_space<vmem>>, vector<8x32xf32>,
    return
  }
  func.func @transform_0(%arg0: i32) -> (i32, i32) {
    %c0_i32 = arith.constant 0 : i32
    %c0_i32_0 = arith.constant 0 : i32
    %c0_i32_1 = arith.constant 0 : i32
    return %c0_i32, %c0_i32_0 : i32, i32
  }
  func.func @transform_1(%arg0: i32) -> (i32, i32) {
    %c0_i32 = arith.constant 0 : i32
    %c0_i32_0 = arith.constant 0 : i32
    return %arg0, %c0_i32 : i32, i32
  }
}

</mosaic_0001>

<bundles_post_ra>
// kernel: tpu_custom_call.1
= control target key start
LH: loop header
LB: loop body
LE: loop exit
PB: predicated region body
PF: predicated region fallthrough
CT: control target
= control target key end

     0   :  { %6 = vsyncpa [#allocation3], 0  ;;  %s139_s0 = inlined_call_operand.hbm [shape: f32[1,32], index: 0, kind: input, shape index: {}]   ;;  %s140_s1 = inlined_call_operand.hbm [shape: f32[8,32], index: 1, kind: output, shape index: {}]  }
   0x1   :  { %7 = vsyncpa [#allocation4], 0  ;;  %s103_s6 = smov [#allocation2]   ;;  %s55_s10 = scalar_lea.hbm %s139_s0, 16 }
   0x2   :  { %s14_s7 = sshll.u32 %s103_s6, 4  ;;  %p56_p0 = scmp.ne.s32.totalorder %s139_s0, %s55_s10  ;;  %s15_s7 = int_to_ptr.vmem [resolvable:$true] %s14_s7 }
   0x3   :  { %p59_p1 = scmp.lt.u32.totalorder %s55_s10, %s139_s0 }
   0x5   :  { %p61_p2 = pnand %p59_p1, %p56_p0 }
   0x7   :  { %64 = shalt.err (!%p61_p2)
}
   0x8   :  { %s65_s15 = scalar_lea.vmem %s15_s7, 16  ;;  %s69_s16 = scalar_lea.vmem %s15_s7, 32 }
   0x9   :  { %p66_p3 = scmp.ne.s32.totalorder %s15_s7, %s65_s15  ;;  %p70_p4 = scmp.lt.s32.totalorder %s15_s7, %s15_s7 }
   0xa   :  { %p71_p5 = scmp.lt.s32.totalorder %s69_s16, %s65_s15 }
   0xc   :  { %p72_p6 = por %p71_p5, %p70_p4 }
   0xe   :  { %p73_p7 = pnand %p72_p6, %p66_p3 }
  0x10   :  { %76 = shalt.err (!%p73_p7)
}
  0x11   :  { %17 = dma.hbm_to_vmem [thread:$0]  %s139_s0, 16, %s15_s7, [#allocation3]  }
  0x12   :  { %99 = dma.done.wait [#allocation3], 16  }
  0x13   :  { %100 = vsyncadd [#allocation3], 4294967280  ;;  %v22_v0 = vlaneseq  ;;  %s104_s19 = smov [#allocation5]   ;;  %v52_v3 = vld [vmem:[#allocation2] ss:$0 sm:$0xff]  ;;  %vm35_vm0 = vcmask 261120  }
  0x14   :  { %s43_s20 = sshll.u32 %s104_s19, 4  ;;  %s44_s20 = int_to_ptr.vmem [resolvable:$true] %s43_s20 }
  0x15   :  { %v23_v1 = vshrl.u32 %v22_v0, 7  ;;  %s77_s21 = scalar_lea.vmem %s44_s20, 128  ;;  %p82_p9 = scmp.lt.s32.totalorder %s44_s20, %s44_s20 }
  0x16   :  { %p78_p8 = scmp.ne.s32.totalorder %s44_s20, %s77_s21  ;;  %p83_p10 = scmp.lt.s32.totalorder %s77_s21, %s77_s21 }
  0x17   :  { %v26_v2 = vcvt.s32.f32 %v23_v1 }
  0x18   :  { %p84_p11 = por %p83_p10, %p82_p9 }
  0x19   :  { %v34_v4 = vmul.f32 %v52_v3, %v26_v2 }
  0x1a   :  { %p85_p12 = pnand %p84_p11, %p78_p8 }
  0x1b   :  { %36 = vst.msk [vmem:[#allocation5] sm:$0xff] %vm35_vm0, %v34_v4 }
  0x1c   :  { %88 = shalt.err (!%p85_p12)
}
  0x1d   :  { %s89_s23 = scalar_lea.hbm %s140_s1, 128 }
  0x1e   :  { %p90_p13 = scmp.ne.s32.totalorder %s140_s1, %s89_s23  ;;  %p93_p0 = scmp.lt.u32.totalorder %s89_s23, %s140_s1 }
  0x20   :  { %p95_p1 = pnand %p93_p0, %p90_p13 }
  0x22   :  { %98 = shalt.err (!%p95_p1)
}
  0x23   :  { %46 = dma.vmem_to_hbm [thread:$0]  %s44_s20, 128, %s140_s1, [#allocation4]  }
  0x24   :  { %101 = dma.done.wait [#allocation4], 128  }
  0x25   :  { %102 = vsyncadd [#allocation4], 4294967168 }
  0x26   :  { %50 = vsyncpa [#allocation3], 1 }
  0x27   :  { %51 = vsyncpa [#allocation4], 1 }

</bundles_post_ra>
